<compile_context>
chip_gen: v7x
topology: tpu7x:2x2x1
jax: 0.10.0
libtpu: 0.0.40
codegen_flags: <defaults>
</compile_context>

<pallas_src>
import functools

import jax
import jax.numpy as jnp
from jax.experimental import pallas as pl
from jax.experimental.pallas import tpu as pltpu


def _round_up(x, m):
    return (x + m - 1) // m * m


def _cdiv(a, b):
    return -(-a // b)


# ----------------------------------------------------------------------------
# Kernel: shifted-tap conv matmuls + bias + LeakyReLU + fused BN partial stats
# ----------------------------------------------------------------------------
def _conv_tap_kernel(xm_ref, xh_ref, mask_ref, w_ref, b_ref, y_ref, stats_ref,
                     *, tap_shifts, negative_slope):
    c_out, tq = y_ref.shape
    # Current tile plus right halo so every tap shift stays inside the block.
    xfull = jnp.concatenate([xm_ref[...], xh_ref[...]], axis=1)  # (C_in, tq+halo) bf16

    acc = jnp.zeros((c_out, tq), jnp.float32)
    for t, s in enumerate(tap_shifts):            # static unroll over kH*kW taps
        xtap = xfull[:, s:s + tq]                 # (C_in, tq): small lane-offset slice
        acc = acc + jnp.dot(w_ref[t], xtap, preferred_element_type=jnp.float32)
    acc = acc + b_ref[...]                        # (C_out, tq) + (C_out, 1)
    y = jnp.where(acc >= 0.0, acc, negative_slope * acc)
    y_ref[...] = y.astype(y_ref.dtype)            # bf16 writeback (half the traffic)

    # Fused BatchNorm partial statistics; mask kills garbage / padded columns.
    m = mask_ref[...].astype(jnp.float32)         # (1, tq) of {0, 1}
    yv = y * m
    s1 = jnp.sum(yv, axis=1, keepdims=True)       # (C_out, 1)
    s2 = jnp.sum(yv * y, axis=1, keepdims=True)   # (C_out, 1)
    # TODO(synk): switch to a Welford-style (count, mean, M2) per-tile merge if
    # production M is large enough for E[y^2]-E[y]^2 cancellation to matter.
    stats_ref[...] = jnp.concatenate([s1, s2], axis=1)[None]    # (1, C_out, 2)


# ----------------------------------------------------------------------------
# Wrapper
# ----------------------------------------------------------------------------
def conv_block_forward(x, conv_w, conv_b, bn_gamma, bn_beta, *,
                       stride=1, padding=0, negative_slope=0.2, eps=1e-5,
                       tile_m=16384):
    """x: (N, C_in, H, W) NCHW float32.  Returns (N, C_out, H_out, W_out) f32."""
    N, C_in, H, W = x.shape
    C_out, _, kH, kW = conv_w.shape
    H_out = (H + 2 * padding - kH) // stride + 1
    W_out = (W + 2 * padding - kW) // stride + 1
    Hp, Wp = H + 2 * padding, W + 2 * padding
    M = N * H_out * W_out                       # valid output positions
    Mp = N * Hp * Wp                            # flat window positions computed
    # TODO(synk): for stride > 1 this computes all flat positions (stride^2
    # compute waste); fine for the stride=1 use in csvae.

    shift_max = (kH - 1) * Wp + (kW - 1)
    halo = max(128, _round_up(shift_max, 128))  # right-halo width (lane multiple)

    # Lane tile: large (amortizes ~0.35us/step overhead), multiple of `halo`
    # (so the halo block starts on a block boundary), >=2 tiles when possible
    # so both v7x TensorCores get work on the "parallel" grid axis.
    tq = min(tile_m, _round_up(_cdiv(Mp, 2), halo))
    tq = max(halo, _round_up(tq, halo))
    num_tiles = _cdiv(Mp, tq)
    Mp_pad = num_tiles * tq

    # The only wrapper-side materialization: padded, channel-major, flat input.
    xp = jnp.pad(x, ((0, 0), (0, 0), (padding, padding), (padding, padding)))
    xt = xp.transpose(1, 0, 2, 3).reshape(C_in, Mp)
    xt = jnp.pad(xt, ((0, 0), (0, Mp_pad + halo - Mp))).astype(jnp.bfloat16)

    # Valid-position mask for the BN statistics (bf16 to keep its HBM read small).
    h_stop = (H_out - 1) * stride + 1
    w_stop = (W_out - 1) * stride + 1
    valid = jnp.zeros((N, Hp, Wp), jnp.bfloat16)
    valid = valid.at[:, 0:h_stop:stride, 0:w_stop:stride].set(1.0)
    mask = jnp.pad(valid.reshape(1, Mp), ((0, 0), (0, Mp_pad - Mp)))

    # Per-tap weights (kH*kW, C_out, C_in), bias (C_out, 1): tiny, kept resident.
    wt = conv_w.transpose(2, 3, 0, 1).reshape(kH * kW, C_out, C_in).astype(jnp.bfloat16)
    b_mat = conv_b.reshape(C_out, 1).astype(jnp.float32)
    tap_shifts = tuple(kh * Wp + kw for kh in range(kH) for kw in range(kW))

    ratio = tq // halo
    yt, stats = pl.pallas_call(
        functools.partial(_conv_tap_kernel, tap_shifts=tap_shifts,
                          negative_slope=negative_slope),
        out_shape=(jax.ShapeDtypeStruct((C_out, Mp_pad), jnp.bfloat16),
                   jax.ShapeDtypeStruct((num_tiles, C_out, 2), jnp.float32)),
        grid=(num_tiles,),
        in_specs=[
            pl.BlockSpec((C_in, tq), lambda i: (0, i)),                  # main tile
            pl.BlockSpec((C_in, halo), lambda i: (0, (i + 1) * ratio)),  # right halo
            pl.BlockSpec((1, tq), lambda i: (0, i)),                     # stats mask
            pl.BlockSpec((kH * kW, C_out, C_in), lambda i: (0, 0, 0)),   # weights (resident)
            pl.BlockSpec((C_out, 1), lambda i: (0, 0)),                  # bias (resident)
        ],
        out_specs=[
            pl.BlockSpec((C_out, tq), lambda i: (0, i)),                 # lane-dense y^T
            pl.BlockSpec((1, C_out, 2), lambda i: (i, 0, 0)),            # per-tile stats
        ],
        compiler_params=pltpu.CompilerParams(
            dimension_semantics=("parallel",)),
    )(xt, xt, mask, wt, b_mat)

    # --- BN statistics finalize (O(C_out) scalars, plain JAX) ------------------
    total = jnp.sum(stats, axis=0)                     # (C_out, 2)
    mean = total[:, 0] / M
    var = jnp.maximum(total[:, 1] / M - mean * mean, 0.0)   # biased variance
    inv_std = jax.lax.rsqrt(var + eps)
    gamma = bn_gamma.astype(jnp.float32)
    beta = bn_beta.astype(jnp.float32)
    scale = (gamma * inv_std)[:, None, None, None]
    shift = (beta - mean * gamma * inv_std)[:, None, None, None]

    # --- Dropout2d -------------------------------------------------------------
    # TODO(synk): train-mode Dropout2d(p=0.04) zeroes whole channels with
    # 1/(1-p) scaling before BN; implemented as identity (eval semantics).

    # --- Fused finalize: valid-slice + BN affine + NCHW transpose (one XLA pass)
    y = yt[:, :Mp].reshape(C_out, N, Hp, Wp)[:, :, 0:h_stop:stride, 0:w_stop:stride]
    y = y.astype(jnp.float32) * scale + shift
    return y.transpose(1, 0, 2, 3)


# ----------------------------------------------------------------------------
# Pure-JAX reference (sanity check only)
# ----------------------------------------------------------------------------
def _reference(x, conv_w, conv_b, bn_gamma, bn_beta, *,
               stride, padding, negative_slope, eps):
    y = jax.lax.conv_general_dilated(
        x, conv_w, window_strides=(stride, stride),
        padding=[(padding, padding), (padding, padding)],
        dimension_numbers=("NCHW", "OIHW", "NCHW"))
    y = y + conv_b.reshape(1, -1, 1, 1)
    y = jnp.where(y >= 0.0, y, negative_slope * y)
    mean = jnp.mean(y, axis=(0, 2, 3), keepdims=True)
    var = jnp.mean((y - mean) ** 2, axis=(0, 2, 3), keepdims=True)
    y = (y - mean) * jax.lax.rsqrt(var + eps)
    return y * bn_gamma.reshape(1, -1, 1, 1) + bn_beta.reshape(1, -1, 1, 1)


if __name__ == "__main__":
    # Conv_block(num_features=8, in_channels=4, out_channels=8,
    #            kernel_size=3, stride=1, padding=1)
    N, C_in, H, W = 2, 4, 16, 16
    C_out, kH, kW = 8, 3, 3
    stride, padding = 1, 1
    negative_slope = 0.2

    key = jax.random.PRNGKey(0)
    k_x, k_w, k_b, k_g, k_be = jax.random.split(key, 5)
    x = jax.random.normal(k_x, (N, C_in, H, W), dtype=jnp.float32)
    conv_w = jax.random.normal(k_w, (C_out, C_in, kH, kW), dtype=jnp.float32) * 0.1
    conv_b = jax.random.normal(k_b, (C_out,), dtype=jnp.float32) * 0.1
    bn_gamma = jnp.ones((C_out,), dtype=jnp.float32) + \
        0.1 * jax.random.normal(k_g, (C_out,), dtype=jnp.float32)
    bn_beta = 0.1 * jax.random.normal(k_be, (C_out,), dtype=jnp.float32)

    fwd = jax.jit(functools.partial(
        conv_block_forward, stride=stride, padding=padding,
        negative_slope=negative_slope))
    out = jax.block_until_ready(fwd(x, conv_w, conv_b, bn_gamma, bn_beta))

    ref = _reference(x, conv_w, conv_b, bn_gamma, bn_beta,
                     stride=stride, padding=padding,
                     negative_slope=negative_slope, eps=1e-5)
    assert out.shape == (N, C_out, H, W), out.shape
    # bf16 matmul inputs + bf16 activation storage (f32 accumulation & stats)
    # -> bf16-level tolerance.
    err = float(jnp.max(jnp.abs(out - ref)))
    assert jnp.allclose(out, ref, atol=5e-2, rtol=5e-2), err
    print("KERNEL_OK")
</pallas_src>

<mosaic_0001>
module attributes {stable_mosaic.version = 11 : i64} {
  func.func @_conv_tap_kernel(%arg0: i32, %arg1: memref<4x384xbf16, #tpu.memory_space<vmem>>, %arg2: memref<4x128xbf16, #tpu.memory_space<vmem>>, %arg3: memref<1x384xbf16, #tpu.memory_space<vmem>>, %arg4: memref<9x8x4xbf16, #tpu.memory_space<vmem>>, %arg5: memref<8x1xf32, #tpu.memory_space<vmem>>, %arg6: memref<8x384xbf16, #tpu.memory_space<vmem>>, %arg7: memref<1x8x2xf32, #tpu.memory_space<vmem>>) attributes {dimension_semantics = [#tpu.dimension_semantics<parallel>], iteration_bounds = array<i64: 2>, scalar_prefetch = 0 : i64, scratch_operands = 0 : i64, tpu.core_type = #tpu.core_type<tc>, window_params = [{transform_indices = @transform_0, window_bounds = array<i64: 4, 384>}, {transform_indices = @transform_1, window_bounds = array<i64: 4, 128>}, {transform_indices = @transform_2, window_bounds = array<i64: 1, 384>}, {pipeline_mode = #tpu.pipeline_mode<synchronous>, transform_indices = @transform_3, window_bounds = array<i64: 9, 8, 4>}, {pipeline_mode = #tpu.pipeline_mode<synchronous>, transform_indices = @transform_4, window_bounds = array<i64: 8, 1>}, {transform_indices = @transform_5, window_bounds = array<i64: 8, 384>}, {transform_indices = @transform_6, window_bounds = array<i64: 1, 8, 2>}]} {
    %c0 = arith.constant 0 : index
    %c0_0 = arith.constant 0 : index
    %0 = vector.load %arg1[%c0, %c0_0] : memref<4x384xbf16, #tpu.memory_space<vmem>>, vector<4x384xbf16>
    %c0_1 = arith.constant 0 : index
    %c0_2 = arith.constant 0 : index
    %1 = vector.load %arg2[%c0_1, %c0_2] : memref<4x128xbf16, #tpu.memory_space<vmem>>, vector<4x128xbf16>
    %2 = tpu.concatenate %0, %1 in 1 : vector<4x384xbf16>, vector<4x128xbf16> -> vector<4x512xbf16>
    %cst = arith.constant 0.000000e+00 : f32
    %3 = vector.broadcast %cst : f32 to vector<8x384xf32>
    %4 = vector.extract_strided_slice %2 {offsets = [0, 0], sizes = [4, 384], strides = [1, 1]} : vector<4x512xbf16> to vector<4x384xbf16>
    %c0_3 = arith.constant 0 : index
    %c0_4 = arith.constant 0 : index
    %c0_5 = arith.constant 0 : index
    %5 = vector.load %arg4[%c0_3, %c0_4, %c0_5] : memref<9x8x4xbf16, #tpu.memory_space<vmem>>, vector<1x8x4xbf16>
    %6 = vector.shape_cast %5 : vector<1x8x4xbf16> to vector<8x4xbf16>
    %cst_6 = arith.constant dense<0.000000e+00> : vector<8x384xf32>
    %7 = tpu.matmul %6, %4, %cst_6 {dimension_numbers = #tpu.dot_dimension_numbers<[1], [0], [0], [1], [0, 0, 1, 1], [], []>} : vector<8x4xbf16>, vector<4x384xbf16>, vector<8x384xf32> -> vector<8x384xf32>
    %8 = arith.addf %3, %7 : vector<8x384xf32>
    %9 = vector.extract_strided_slice %2 {offsets = [0, 1], sizes = [4, 384], strides = [1, 1]} : vector<4x512xbf16> to vector<4x384xbf16>
    %c1 = arith.constant 1 : index
    %c0_7 = arith.constant 0 : index
    %c0_8 = arith.constant 0 : index
    %10 = vector.load %arg4[%c1, %c0_7, %c0_8] : memref<9x8x4xbf16, #tpu.memory_space<vmem>>, vector<1x8x4xbf16>
    %11 = vector.shape_cast %10 : vector<1x8x4xbf16> to vector<8x4xbf16>
    %cst_9 = arith.constant dense<0.000000e+00> : vector<8x384xf32>
    %12 = tpu.matmul %11, %9, %cst_9 {dimension_numbers = #tpu.dot_dimension_numbers<[1], [0], [0], [1], [0, 0, 1, 1], [], []>} : vector<8x4xbf16>, vector<4x384xbf16>, vector<8x384xf32> -> vector<8x384xf32>
    %13 = arith.addf %8, %12 : vector<8x384xf32>
    %14 = vector.extract_strided_slice %2 {offsets = [0, 2], sizes = [4, 384], strides = [1, 1]} : vector<4x512xbf16> to vector<4x384xbf16>
    %c2 = arith.constant 2 : index
    %c0_10 = arith.constant 0 : index
    %c0_11 = arith.constant 0 : index
    %15 = vector.load %arg4[%c2, %c0_10, %c0_11] : memref<9x8x4xbf16, #tpu.memory_space<vmem>>, vector<1x8x4xbf16>
    %16 = vector.shape_cast %15 : vector<1x8x4xbf16> to vector<8x4xbf16>
    %cst_12 = arith.constant dense<0.000000e+00> : vector<8x384xf32>
    %17 = tpu.matmul %16, %14, %cst_12 {dimension_numbers = #tpu.dot_dimension_numbers<[1], [0], [0], [1], [0, 0, 1, 1], [], []>} : vector<8x4xbf16>, vector<4x384xbf16>, vector<8x384xf32> -> vector<8x384xf32>
    %18 = arith.addf %13, %17 : vector<8x384xf32>
    %19 = vector.extract_strided_slice %2 {offsets = [0, 18], sizes = [4, 384], strides = [1, 1]} : vector<4x512xbf16> to vector<4x384xbf16>
    %c3 = arith.constant 3 : index
    %c0_13 = arith.constant 0 : index
    %c0_14 = arith.constant 0 : index
    %20 = vector.load %arg4[%c3, %c0_13, %c0_14] : memref<9x8x4xbf16, #tpu.memory_space<vmem>>, vector<1x8x4xbf16>
    %21 = vector.shape_cast %20 : vector<1x8x4xbf16> to vector<8x4xbf16>
    %cst_15 = arith.constant dense<0.000000e+00> : vector<8x384xf32>
    %22 = tpu.matmul %21, %19, %cst_15 {dimension_numbers = #tpu.dot_dimension_numbers<[1], [0], [0], [1], [0, 0, 1, 1], [], []>} : vector<8x4xbf16>, vector<4x384xbf16>, vector<8x384xf32> -> vector<8x384xf32>
    %23 = arith.addf %18, %22 : vector<8x384xf32>
    %24 = vector.extract_strided_slice %2 {offsets = [0, 19], sizes = [4, 384], strides = [1, 1]} : vector<4x512xbf16> to vector<4x384xbf16>
    %c4 = arith.constant 4 : index
    %c0_16 = arith.constant 0 : index
    %c0_17 = arith.constant 0 : index
    %25 = vector.load %arg4[%c4, %c0_16, %c0_17] : memref<9x8x4xbf16, #tpu.memory_space<vmem>>, vector<1x8x4xbf16>
    %26 = vector.shape_cast %25 : vector<1x8x4xbf16> to vector<8x4xbf16>
    %cst_18 = arith.constant dense<0.000000e+00> : vector<8x384xf32>
    %27 = tpu.matmul %26, %24, %cst_18 {dimension_numbers = #tpu.dot_dimension_numbers<[1], [0], [0], [1], [0, 0, 1, 1], [], []>} : vector<8x4xbf16>, vector<4x384xbf16>, vector<8x384xf32> -> vector<8x384xf32>
    %28 = arith.addf %23, %27 : vector<8x384xf32>
    %29 = vector.extract_strided_slice %2 {offsets = [0, 20], sizes = [4, 384], strides = [1, 1]} : vector<4x512xbf16> to vector<4x384xbf16>
    %c5 = arith.constant 5 : index
    %c0_19 = arith.constant 0 : index
    %c0_20 = arith.constant 0 : index
    %30 = vector.load %arg4[%c5, %c0_19, %c0_20] : memref<9x8x4xbf16, #tpu.memory_space<vmem>>, vector<1x8x4xbf16>
    %31 = vector.shape_cast %30 : vector<1x8x4xbf16> to vector<8x4xbf16>
    %cst_21 = arith.constant dense<0.000000e+00> : vector<8x384xf32>
    %32 = tpu.matmul %31, %29, %cst_21 {dimension_numbers = #tpu.dot_dimension_numbers<[1], [0], [0], [1], [0, 0, 1, 1], [], []>} : vector<8x4xbf16>, vector<4x384xbf16>, vector<8x384xf32> -> vector<8x384xf32>
    %33 = arith.addf %28, %32 : vector<8x384xf32>
    %34 = vector.extract_strided_slice %2 {offsets = [0, 36], sizes = [4, 384], strides = [1, 1]} : vector<4x512xbf16> to vector<4x384xbf16>
    %c6 = arith.constant 6 : index
    %c0_22 = arith.constant 0 : index
    %c0_23 = arith.constant 0 : index
    %35 = vector.load %arg4[%c6, %c0_22, %c0_23] : memref<9x8x4xbf16, #tpu.memory_space<vmem>>, vector<1x8x4xbf16>
    %36 = vector.shape_cast %35 : vector<1x8x4xbf16> to vector<8x4xbf16>
    %cst_24 = arith.constant dense<0.000000e+00> : vector<8x384xf32>
    %37 = tpu.matmul %36, %34, %cst_24 {dimension_numbers = #tpu.dot_dimension_numbers<[1], [0], [0], [1], [0, 0, 1, 1], [], []>} : vector<8x4xbf16>, vector<4x384xbf16>, vector<8x384xf32> -> vector<8x384xf32>
    %38 = arith.addf %33, %37 : vector<8x384xf32>
    %39 = vector.extract_strided_slice %2 {offsets = [0, 37], sizes = [4, 384], strides = [1, 1]} : vector<4x512xbf16> to vector<4x384xbf16>
    %c7 = arith.constant 7 : index
    %c0_25 = arith.constant 0 : index
    %c0_26 = arith.constant 0 : index
    %40 = vector.load %arg4[%c7, %c0_25, %c0_26] : memref<9x8x4xbf16, #tpu.memory_space<vmem>>, vector<1x8x4xbf16>
    %41 = vector.shape_cast %40 : vector<1x8x4xbf16> to vector<8x4xbf16>
    %cst_27 = arith.constant dense<0.000000e+00> : vector<8x384xf32>
    %42 = tpu.matmul %41, %39, %cst_27 {dimension_numbers = #tpu.dot_dimension_numbers<[1], [0], [0], [1], [0, 0, 1, 1], [], []>} : vector<8x4xbf16>, vector<4x384xbf16>, vector<8x384xf32> -> vector<8x384xf32>
    %43 = arith.addf %38, %42 : vector<8x384xf32>
    %44 = vector.extract_strided_slice %2 {offsets = [0, 38], sizes = [4, 384], strides = [1, 1]} : vector<4x512xbf16> to vector<4x384xbf16>
    %c8 = arith.constant 8 : index
    %c0_28 = arith.constant 0 : index
    %c0_29 = arith.constant 0 : index
    %45 = vector.load %arg4[%c8, %c0_28, %c0_29] : memref<9x8x4xbf16, #tpu.memory_space<vmem>>, vector<1x8x4xbf16>
    %46 = vector.shape_cast %45 : vector<1x8x4xbf16> to vector<8x4xbf16>
    %cst_30 = arith.constant dense<0.000000e+00> : vector<8x384xf32>
    %47 = tpu.matmul %46, %44, %cst_30 {dimension_numbers = #tpu.dot_dimension_numbers<[1], [0], [0], [1], [0, 0, 1, 1], [], []>} : vector<8x4xbf16>, vector<4x384xbf16>, vector<8x384xf32> -> vector<8x384xf32>
    %48 = arith.addf %43, %47 : vector<8x384xf32>
    %c0_31 = arith.constant 0 : index
    %c0_32 = arith.constant 0 : index
    %49 = vector.load %arg5[%c0_31, %c0_32] : memref<8x1xf32, #tpu.memory_space<vmem>>, vector<8x1xf32>
    %50 = vector.broadcast %49 : vector<8x1xf32> to vector<8x384xf32>
    %51 = arith.addf %48, %50 : vector<8x384xf32>
    %cst_33 = arith.constant 0.000000e+00 : f32
    %52 = vector.broadcast %cst_33 : f32 to vector<8x384xf32>
    %53 = arith.cmpf oge, %51, %52 : vector<8x384xf32>
    %cst_34 = arith.constant 2.000000e-01 : f32
    %54 = vector.broadcast %cst_34 : f32 to vector<8x384xf32>
    %55 = arith.mulf %54, %51 : vector<8x384xf32>
    %56 = arith.select %53, %51, %55 : vector<8x384xi1>, vector<8x384xf32>
    %57 = arith.truncf %56 : vector<8x384xf32> to vector<8x384xbf16>
    %c0_35 = arith.constant 0 : index
    %c0_36 = arith.constant 0 : index
    %58 = vector.load %arg6[%c0_35, %c0_36] : memref<8x384xbf16, #tpu.memory_space<vmem>>, vector<8x384xbf16>
    tpu.vector_store %arg6[%c0_35, %c0_36], %57 {strides = array<i32>} : memref<8x384xbf16, #tpu.memory_space<vmem>>, vector<8x384xbf16>,
    %c0_37 = arith.constant 0 : index
    %c0_38 = arith.constant 0 : index
    %59 = vector.load %arg3[%c0_37, %c0_38] : memref<1x384xbf16, #tpu.memory_space<vmem>>, vector<1x384xbf16>
    %60 = arith.extf %59 : vector<1x384xbf16> to vector<1x384xf32>
    %61 = vector.broadcast %60 : vector<1x384xf32> to vector<8x384xf32>
    %62 = arith.mulf %56, %61 : vector<8x384xf32>
    %cst_39 = arith.constant dense<0.000000e+00> : vector<8xf32>
    %63 = vector.multi_reduction <add>, %62, %cst_39 [1] : vector<8x384xf32> to vector<8xf32>
    %64 = vector.shape_cast %63 : vector<8xf32> to vector<8x1xf32>
    %65 = arith.mulf %62, %56 : vector<8x384xf32>
    %cst_40 = arith.constant dense<0.000000e+00> : vector<8xf32>
    %66 = vector.multi_reduction <add>, %65, %cst_40 [1] : vector<8x384xf32> to vector<8xf32>
    %67 = vector.shape_cast %66 : vector<8xf32> to vector<8x1xf32>
    %68 = tpu.concatenate %64, %67 in 1 : vector<8x1xf32>, vector<8x1xf32> -> vector<8x2xf32>
    %69 = vector.shape_cast %68 : vector<8x2xf32> to vector<1x8x2xf32>
    %c0_41 = arith.constant 0 : index
    %c0_42 = arith.constant 0 : index
    %c0_43 = arith.constant 0 : index
    %70 = vector.load %arg7[%c0_41, %c0_42, %c0_43] : memref<1x8x2xf32, #tpu.memory_space<vmem>>, vector<1x8x2xf32>
    tpu.vector_store %arg7[%c0_41, %c0_42, %c0_43], %69 {strides = array<i32>} : memref<1x8x2xf32, #tpu.memory_space<vmem>>, vector<1x8x2xf32>,
    return
  }
  func.func @transform_0(%arg0: i32) -> (i32, i32) {
    %c0_i32 = arith.constant 0 : i32
    %c0_i32_0 = arith.constant 0 : i32
    return %c0_i32, %arg0 : i32, i32
  }
  func.func @transform_1(%arg0: i32) -> (i32, i32) {
    %c1_i32 = arith.constant 1 : i32
    %0 = arith.addi %arg0, %c1_i32 : i32
    %c3_i32 = arith.constant 3 : i32
    %1 = arith.muli %0, %c3_i32 : i32
    %c0_i32 = arith.constant 0 : i32
    %c0_i32_0 = arith.constant 0 : i32
    return %c0_i32, %1 : i32, i32
  }
  func.func @transform_2(%arg0: i32) -> (i32, i32) {
    %c0_i32 = arith.constant 0 : i32
    %c0_i32_0 = arith.constant 0 : i32
    return %c0_i32, %arg0 : i32, i32
  }
  func.func @transform_3(%arg0: i32) -> (i32, i32, i32) {
    %c0_i32 = arith.constant 0 : i32
    %c0_i32_0 = arith.constant 0 : i32
    %c0_i32_1 = arith.constant 0 : i32
    %c0_i32_2 = arith.constant 0 : i32
    return %c0_i32, %c0_i32_0, %c0_i32_1 : i32, i32, i32
  }
  func.func @transform_4(%arg0: i32) -> (i32, i32) {
    %c0_i32 = arith.constant 0 : i32
    %c0_i32_0 = arith.constant 0 : i32
    %c0_i32_1 = arith.constant 0 : i32
    return %c0_i32, %c0_i32_0 : i32, i32
  }
  func.func @transform_5(%arg0: i32) -> (i32, i32) {
    %c0_i32 = arith.constant 0 : i32
    %c0_i32_0 = arith.constant 0 : i32
    return %c0_i32, %arg0 : i32, i32
  }
  func.func @transform_6(%arg0: i32) -> (i32, i32, i32) {
    %c0_i32 = arith.constant 0 : i32
    %c0_i32_0 = arith.constant 0 : i32
    %c0_i32_1 = arith.constant 0 : i32
    return %arg0, %c0_i32, %c0_i32_0 : i32, i32, i32
  }
}

</mosaic_0001>

<bundles_post_ra>
// kernel: conv_block_forward.1
= control target key start
LH: loop header
LB: loop body
LE: loop exit
PB: predicated region body
PF: predicated region fallthrough
CT: control target
= control target key end

     0   :  { %s1718_s21 = smov 0   ;;  %s1902_s0 = inlined_call_operand.vmem [shape: bf16[4,896], index: 0, kind: input, shape index: {}, may-alias: {0,1}]   ;;  %s1903_s1 = inlined_call_operand.vmem [shape: bf16[4,896], index: 1, kind: input, shape index: {}, may-alias: {0,1}]   ;;  %s1904_s2 = inlined_call_operand.vmem [shape: bf16[1,768], index: 2, kind: input, shape index: {}]   ;;  %s1905_s3 = inlined_call_operand.vmem [shape: bf16[9,8,4], index: 3, kind: input, shape index: {}]   ;;  %s1906_s4 = inlined_call_operand.vmem [shape: f32[8,1], index: 4, kind: input, shape index: {}]   ;;  %s1907_s5 = inlined_call_operand.vmem [shape: bf16[8,768], index: 5, kind: output, shape index: {0}]   ;;  %s1908_s6 = inlined_call_operand.vmem [shape: f32[2,8,2], index: 6, kind: output, shape index: {1}]  }
   0x1 LB: > { %s1724_s22 = sadd.s32 4294967295, %s1669_s21   ;;  %p1523_p0 = scmp.ge.s32.totalorder %s1669_s21, 1  ;;  %s1669_s21 = sphi %s1718_s21, %s17_s21  }
   0x2   : > { %p251_p1 = scmp.lt.s32.totalorder %s1669_s21, 3 }
   0x4   : > { %p252_p2 = pnand %p1523_p0, %p251_p1 }
   0x5   : > { %s1729_s23 = smul.u32 (!%p252_p2), 3, %s1724_s22  ;;  %v344_v0 = vlaneseq (!%p252_p2)  ;;  %v1671_v1 = vmov (!%p252_p2), 1983009808   ;;  %s313_s24 = sadd.s32 (!%p252_p2), 1, %s1724_s22  ;;  %v1672_v6 = vmov (!%p252_p2), 0.0   ;;  %v1673_v7 = vmov (!%p252_p2), 0  }
   0x6   : > { %255 = sbr.rel (%p252_p2) target bundleno = 580 (0x244), region = 40  ;;  %v342_v2 = vunpack.c.l.s4 (!%p252_p2), %v1671_v1  ;;  %1587 = vmatprep.subr.bf16.mxu1 (!%p252_p2), %v1672_v6  ;;  %418 = vmatprep.mubr.bf16.mxu0 (!%p252_p2), %v1673_v7  ;;  %vm1674_vm0 = vmmov (!%p252_p2), 0   ;;  %s1675_s8 = smov (!%p252_p2), 127   ;;  %v1330_v14 = vld [vmem:[%s1906_s4] sm:$0xff] (!%p252_p2)  ;;  %vm368_vm1 = vcmask (!%p252_p2), 1039360   ;;  %vm376_vm2 = vcmask (!%p252_p2), 1041408  }
   0x7   : > { %p304_p3 = scmp.lt.s32.totalorder (!%p252_p2), %s1729_s23, 6  ;;  %v1733_v3 = vshrl.u32 (!%p252_p2), %v344_v0, 7  ;;  %s314_s25 = smul.u32 (!%p252_p2), 3, %s313_s24  ;;  %1661 = vset.pattern.permute.xlu0 (!%p252_p2), %v1673_v7  ;;  %1589 = vmatprep.mubr.msk.bf16.mxu1 (!%p252_p2), %vm1674_vm0, %v1672_v6  ;;  %v1528_v23 = vld [vmem:[%s1905_s3 + $0x4] sm:$0xf] (!%p252_p2)  ;;  %vm372_vm3 = vcmask (!%p252_p2), 31744  }
   0x8   : > { %v343_v4 = vunpack.c.0.s8 (!%p252_p2), %v342_v2  ;;  %s1676_s12 = smov (!%p252_p2), 126   ;;  %s1677_s13 = smov (!%p252_p2), 110   ;;  %vm570_vm4 = vcmask (!%p252_p2), 1031168   ;;  %v356_v34 = vld [vmem:[%s1905_s3] sm:$0xf] (!%p252_p2)  ;;  %vm680_vm5 = vcmask (!%p252_p2), 900096  }
   0x9   : > { %p315_p4 = scmp.lt.s32.totalorder (!%p252_p2), %s314_s25, 6  ;;  %s1678_s14 = smov (!%p252_p2), 109   ;;  %v1535_v44 = vld [vmem:[%s1905_s3 + $0x8] sm:$0xf] (!%p252_p2)  ;;  %vm790_vm6 = vcmask (!%p252_p2), 891904   ;;  %vm900_vm7 = vcmask (!%p252_p2), 883712  }
   0xa   : > { %v346_v5 = vsub.s32 (!%p252_p2), %v343_v4, %v1733_v3  ;;  %s1679_s15 = smov (!%p252_p2), 108   ;;  %s1680_s16 = smov (!%p252_p2), 92   ;;  %v1539_v54 = vld [vmem:[%s1905_s3 + $0xc] sm:$0xf] (!%p252_p2)  ;;  %v1543_v0 = vld [vmem:[%s1905_s3 + $0x10] sm:$0xf] (!%p252_p2) }
   0xb   : > { %s1681_s17 = smov (!%p252_p2), 91   ;;  %s1682_s18 = smov (!%p252_p2), 90   ;;  %vm1010_vm8 = vcmask (!%p252_p2), 752640   ;;  %vm1120_vm9 = vcmask (!%p252_p2), 744448   ;;  %vm1230_vm10 = vcmask (!%p252_p2), 736256   ;;  %vm1407_vm14 = vcmask (!%p252_p2), 7168  }
   0xc   : > { %p322_p5 = scmp.lt.s32.totalorder (!%p252_p2), %s1729_s23, 5  ;;  %p332_p6 = scmp.lt.s32.totalorder (!%p252_p2), %s1724_s22, 1  ;;  %vm1409_vm15 = vcmask (!%p252_p2), 15360  }
   0xd   : > { %s305_s26 = scalar_select %p304_p3, %s1729_s23, 6 }
   0xe   : > { %s1910_s25 = smov (!%p315_p4, %s314_s25), 6  ;;  %s1912_s23 = smov (!%p322_p5, %s1729_s23), 5 }
   0xf   : > { %s1524_s27 = sshll.u32 %s305_s26, 1  ;;  %s1525_s7 = sshll.u32 %s1910_s25, 1 }
  0x10   : > { %s307_s30 = scalar_lea.vmem %s1902_s0, %s1524_s27  ;;  %s318_s11 = scalar_lea.vmem %s1903_s1, %s1525_s7 }
  0x11   : > { %v337_v8 = vld [vmem:[%s307_s30] sm:$0x3f]  ;;  %s324_s20 = scalar_lea.vmem %s1904_s2, %s1912_s23  ;;  %s1526_s24 = sshll.u32 %s1912_s23, 2 }
  0x12   : > { %v1745_v9 = vrot.slane %v337_v8, %v346_v5  ;;  %v340_v10 = vcombine.high %v337_v8, %v337_v8  ;;  %v338_v13 = vld [vmem:[%s318_s11] sm:$0x3]  ;;  %s330_s27 = scalar_lea.vmem %s1907_s5, %s1526_s24  ;;  %s1914_s22 = smov (!%p332_p6, %s1724_s22), 1 }
  0x13   : > { %s1527_s23 = sshll.u32 %s1914_s22, 3 }
  0x14   : > { %360 = vrot.lane.b32.xlu0 %v1745_v9, %s1675_s8  ;;  %v1748_v11 = vrot.slane %v340_v10, %v346_v5  ;;  %v355_v12 = vcombine.high %v1745_v9, %v1745_v9  ;;  %v471_v26 = vsel %vm376_vm2, %v1745_v9, 0  ;;  %s335_s30 = scalar_lea.vmem %s1908_s6, %s1527_s23 }
  0x16   : > { %364 = vrot.lane.b32.xlu1 %v1748_v11, %s1675_s8  ;;  %v477_v28 = vsel %vm376_vm2, %v1748_v11, 0 }
  0x18   : > { %362 = vrot.lane.b32.xlu0 %v355_v12, %s1675_s8 }
  0x1a   : > { %366 = vrot.lane.b32.xlu1 %v338_v13, %s1675_s8 }
  0x1c   : > { %562 = vrot.lane.b32.xlu0 %v1745_v9, %s1676_s12 }
  0x1e   : > { %564 = vrot.lane.b32.xlu1 %v355_v12, %s1676_s12 }
  0x20   : > { %566 = vrot.lane.b32.xlu0 %v1748_v11, %s1676_s12 }
  0x22   : > { %568 = vrot.lane.b32.xlu1 %v338_v13, %s1676_s12 }
  0x24   : > { %672 = vrot.lane.b32.xlu0 %v1745_v9, %s1677_s13 }
  0x26   : > { %674 = vrot.lane.b32.xlu1 %v355_v12, %s1677_s13 }
  0x28   : > { %676 = vrot.lane.b32.xlu0 %v1748_v11, %s1677_s13 }
  0x2a   : > { %678 = vrot.lane.b32.xlu1 %v338_v13, %s1677_s13 }
  0x2c   : > { %782 = vrot.lane.b32.xlu0 %v1745_v9, %s1678_s14 }
  0x2e   : > { %784 = vrot.lane.b32.xlu1 %v355_v12, %s1678_s14 }
  0x30   : > { %786 = vrot.lane.b32.xlu0 %v1748_v11, %s1678_s14 }
  0x32   : > { %788 = vrot.lane.b32.xlu1 %v338_v13, %s1678_s14 }
  0x34   : > { %892 = vrot.lane.b32.xlu0 %v1745_v9, %s1679_s15 }
  0x36   : > { %894 = vrot.lane.b32.xlu1 %v355_v12, %s1679_s15 }
  0x38   : > { %896 = vrot.lane.b32.xlu0 %v1748_v11, %s1679_s15 }
  0x3a   : > { %898 = vrot.lane.b32.xlu1 %v338_v13, %s1679_s15 }
  0x3c   : > { %1002 = vrot.lane.b32.xlu0 %v1745_v9, %s1680_s16 }
  0x3e   : > { %1004 = vrot.lane.b32.xlu1 %v355_v12, %s1680_s16 }
  0x40   : > { %1006 = vrot.lane.b32.xlu0 %v1748_v11, %s1680_s16 }
  0x42   : > { %1008 = vrot.lane.b32.xlu1 %v338_v13, %s1680_s16 }
  0x44   : > { %1112 = vrot.lane.b32.xlu0 %v1745_v9, %s1681_s17 }
  0x46   : > { %1114 = vrot.lane.b32.xlu1 %v355_v12, %s1681_s17 }
  0x48   : > { %1116 = vrot.lane.b32.xlu0 %v1748_v11, %s1681_s17 }
  0x4a   : > { %1118 = vrot.lane.b32.xlu1 %v338_v13, %s1681_s17 }
  0x4c   : > { %1222 = vrot.lane.b32.xlu0 %v1745_v9, %s1682_s18 }
  0x4e   : > { %1224 = vrot.lane.b32.xlu1 %v355_v12, %s1682_s18 }
  0x50   : > { %1226 = vrot.lane.b32.xlu0 %v1748_v11, %s1682_s18 }
  0x52   : > { %1228 = vrot.lane.b32.xlu1 %v338_v13, %s1682_s18  ;;  %v1547_v13 = vld [vmem:[%s1905_s3 + $0x14] sm:$0xf] }
  0x54   : > { %1333 = vperm.xlu0 %1661, %v1330_v14  }
  0x86   : > { %v361_v15 = vpop.permute.xlu0 %360 }
  0x88   : > { %v365_v16 = vpop.permute.xlu1 %364 }
  0x8a   : > { %v363_v17 = vpop.permute.xlu0 %362 }
  0x8b   : > { %v370_v18 = vsel %vm368_vm1, %v363_v17, %v365_v16  ;;  %v369_v19 = vsel %vm368_vm1, %v361_v15, %v363_v17 }
  0x8c   : > { %1529 = vmatprep.subr.msk.bf16.mxu0 %vm376_vm2, %v370_v18  ;;  %v367_v20 = vpop.permute.xlu1 %366  ;;  %v378_v21 = vsel %vm376_vm2, %v369_v19, 0 }
  0x8d   : > { %387 = vmatpush1.bf16.msra.mxu0 %v378_v21  ;;  %v371_v22 = vsel %vm368_vm1, %v365_v16, %v367_v20 }
  0x8e   : > { %v384_v24 = vsel %vm376_vm2, %v371_v22, 0  ;;  %1532 = vmatprep.subr.msk.bf16.mxu0 %vm376_vm2, %v355_v12  ;;  %v563_v25 = vpop.permute.xlu0 %562 }
  0x8f   : > { %1588 = vmatpush3.bf16.msra.mxu1 %v384_v24 }
  0x90   : > { %1530 = vmatmul.mubr.msk.bf16.vlgmr.msra.gmra.mrb[0].mxu0 %vm372_vm3, %v1528_v23  ;;  %v565_v27 = vpop.permute.xlu1 %564  ;;  %1593 = vmatprep.subr.bf16.mxu1 %v1672_v6 }
  0x91   : > { %480 = vmatpush1.bf16.msra.mxu0 %v471_v26  ;;  %511 = vmatprep.mubr.bf16.mxu0 %v1673_v7  ;;  %v571_v30 = vsel %vm570_vm4, %v563_v25, %v565_v27 }
  0x92   : > { %1590 = vmatmul.mubr.msk.bf16.vlgmr.msra.gmra.mrb[0].mxu1 %vm372_vm3, %v1528_v23  ;;  %v567_v29 = vpop.permute.xlu0 %566  ;;  %v578_v35 = vsel %vm376_vm2, %v571_v30, 0  ;;  %v1551_v23 = vld [vmem:[%s1905_s3 + $0x18] sm:$0xf] }
  0x93   : > { %1594 = vmatpush3.bf16.msra.mxu1 %v477_v28  ;;  %v572_v31 = vsel %vm570_vm4, %v565_v27, %v567_v29  ;;  %1595 = vmatprep.mubr.msk.bf16.mxu1 %vm1674_vm0, %v1672_v6 }
  0x94   : > { %v569_v32 = vpop.permute.xlu1 %568  ;;  %1536 = vmatprep.subr.msk.bf16.mxu0 %vm376_vm2, %v572_v31  ;;  %1599 = vmatprep.subr.bf16.mxu1 %v1672_v6 }
  0x95   : > { %v573_v33 = vsel %vm570_vm4, %v567_v29, %v569_v32 }
  0x96   : > { %v673_v36 = vpop.permute.xlu0 %672  ;;  %v584_v37 = vsel %vm376_vm2, %v573_v33, 0  ;;  %v1555_v33 = vld [vmem:[%s1905_s3 + $0x1c] sm:$0xf] }
  0x98   : > { %1533 = vmatmul.mubr.msk.bf16.vlgmr.msra.gmra.mrb[4].mxu0 %vm372_vm3, %v356_v34  ;;  %v675_v38 = vpop.permute.xlu1 %674 }
  0x99   : > { %587 = vmatpush1.bf16.msra.mxu0 %v578_v35  ;;  %618 = vmatprep.mubr.bf16.mxu0 %v1673_v7  ;;  %v681_v40 = vsel %vm680_vm5, %v673_v36, %v675_v38  ;;  %v1559_v36 = vld [vmem:[%s1905_s3 + $0x20] sm:$0xf] }
  0x9a   : > { %1596 = vmatmul.mubr.msk.bf16.vlgmr.msra.gmra.mrb[4].mxu1 %vm372_vm3, %v356_v34  ;;  %v677_v39 = vpop.permute.xlu0 %676  ;;  %v688_v45 = vsel %vm376_vm2, %v681_v40, 0 }
  0x9b   : > { %1600 = vmatpush3.bf16.msra.mxu1 %v584_v37  ;;  %v682_v41 = vsel %vm680_vm5, %v675_v38, %v677_v39  ;;  %1601 = vmatprep.mubr.msk.bf16.mxu1 %vm1674_vm0, %v1672_v6 }
  0x9c   : > { %v679_v42 = vpop.permute.xlu1 %678  ;;  %1540 = vmatprep.subr.msk.bf16.mxu0 %vm376_vm2, %v682_v41  ;;  %1605 = vmatprep.subr.bf16.mxu1 %v1672_v6 }
  0x9d   : > { %v683_v43 = vsel %vm680_vm5, %v677_v39, %v679_v42 }
  0x9e   : > { %v783_v46 = vpop.permute.xlu0 %782  ;;  %v694_v47 = vsel %vm376_vm2, %v683_v43, 0 }
  0xa0   : > { %1537 = vmatmul.mubr.msk.bf16.vlgmr.msra.gmra.mrb[8].mxu0 %vm372_vm3, %v1535_v44  ;;  %v785_v48 = vpop.permute.xlu1 %784 }
  0xa1   : > { %697 = vmatpush1.bf16.msra.mxu0 %v688_v45  ;;  %728 = vmatprep.mubr.bf16.mxu0 %v1673_v7  ;;  %v791_v50 = vsel %vm790_vm6, %v783_v46, %v785_v48 }
  0xa2   : > { %1602 = vmatmul.mubr.msk.bf16.vlgmr.msra.gmra.mrb[8].mxu1 %vm372_vm3, %v1535_v44  ;;  %v787_v49 = vpop.permute.xlu0 %786  ;;  %v798_v55 = vsel %vm376_vm2, %v791_v50, 0 }
  0xa3   : > { %1606 = vmatpush3.bf16.msra.mxu1 %v694_v47  ;;  %v792_v51 = vsel %vm790_vm6, %v785_v48, %v787_v49  ;;  %1607 = vmatprep.mubr.msk.bf16.mxu1 %vm1674_vm0, %v1672_v6 }
  0xa4   : > { %v789_v52 = vpop.permute.xlu1 %788  ;;  %1544 = vmatprep.subr.msk.bf16.mxu0 %vm376_vm2, %v792_v51  ;;  %1611 = vmatprep.subr.bf16.mxu1 %v1672_v6 }
  0xa5   : > { %v793_v53 = vsel %vm790_vm6, %v787_v49, %v789_v52 }
  0xa6   : > { %v893_v56 = vpop.permute.xlu0 %892  ;;  %v804_v57 = vsel %vm376_vm2, %v793_v53, 0 }
  0xa8   : > { %1541 = vmatmul.mubr.msk.bf16.vlgmr.msra.gmra.mrb[12].mxu0 %vm372_vm3, %v1539_v54  ;;  %v895_v58 = vpop.permute.xlu1 %894 }
  0xa9   : > { %807 = vmatpush1.bf16.msra.mxu0 %v798_v55  ;;  %838 = vmatprep.mubr.bf16.mxu0 %v1673_v7  ;;  %v901_v60 = vsel %vm900_vm7, %v893_v56, %v895_v58 }
  0xaa   : > { %1608 = vmatmul.mubr.msk.bf16.vlgmr.msra.gmra.mrb[12].mxu1 %vm372_vm3, %v1539_v54  ;;  %v897_v59 = vpop.permute.xlu0 %896  ;;  %v908_v1 = vsel %vm376_vm2, %v901_v60, 0 }
  0xab   : > { %1612 = vmatpush3.bf16.msra.mxu1 %v804_v57  ;;  %v902_v61 = vsel %vm900_vm7, %v895_v58, %v897_v59  ;;  %1613 = vmatprep.mubr.msk.bf16.mxu1 %vm1674_vm0, %v1672_v6 }
  0xac   : > { %v899_v62 = vpop.permute.xlu1 %898  ;;  %1548 = vmatprep.subr.msk.bf16.mxu0 %vm376_vm2, %v902_v61  ;;  %1617 = vmatprep.subr.bf16.mxu1 %v1672_v6 }
  0xad   : > { %v903_v63 = vsel %vm900_vm7, %v897_v59, %v899_v62 }
  0xae   : > { %v1003_v2 = vpop.permute.xlu0 %1002  ;;  %v914_v4 = vsel %vm376_vm2, %v903_v63, 0 }
  0xb0   : > { %1545 = vmatmul.mubr.msk.bf16.vlgmr.msra.gmra.mrb[16].mxu0 %vm372_vm3, %v1543_v0  ;;  %v1005_v5 = vpop.permute.xlu1 %1004 }
  0xb1   : > { %917 = vmatpush1.bf16.msra.mxu0 %v908_v1  ;;  %948 = vmatprep.mubr.bf16.mxu0 %v1673_v7  ;;  %v1011_v9 = vsel %vm1010_vm8, %v1003_v2, %v1005_v5 }
  0xb2   : > { %1614 = vmatmul.mubr.msk.bf16.vlgmr.msra.gmra.mrb[16].mxu1 %vm372_vm3, %v1543_v0  ;;  %v1007_v8 = vpop.permute.xlu0 %1006  ;;  %v1018_v14 = vsel %vm376_vm2, %v1011_v9, 0 }
  0xb3   : > { %1618 = vmatpush3.bf16.msra.mxu1 %v914_v4  ;;  %v1012_v10 = vsel %vm1010_vm8, %v1005_v5, %v1007_v8  ;;  %1619 = vmatprep.mubr.msk.bf16.mxu1 %vm1674_vm0, %v1672_v6 }
  0xb4   : > { %v1009_v11 = vpop.permute.xlu1 %1008  ;;  %1552 = vmatprep.subr.msk.bf16.mxu0 %vm376_vm2, %v1012_v10  ;;  %1623 = vmatprep.subr.bf16.mxu1 %v1672_v6 }
  0xb5   : > { %v1013_v12 = vsel %vm1010_vm8, %v1007_v8, %v1009_v11 }
  0xb6   : > { %v1113_v15 = vpop.permute.xlu0 %1112  ;;  %v1024_v16 = vsel %vm376_vm2, %v1013_v12, 0 }
  0xb8   : > { %1549 = vmatmul.mubr.msk.bf16.vlgmr.msra.gmra.mrb[20].mxu0 %vm372_vm3, %v1547_v13  ;;  %v1115_v17 = vpop.permute.xlu1 %1114 }
  0xb9   : > { %1027 = vmatpush1.bf16.msra.mxu0 %v1018_v14  ;;  %1058 = vmatprep.mubr.bf16.mxu0 %v1673_v7  ;;  %v1121_v19 = vsel %vm1120_vm9, %v1113_v15, %v1115_v17 }
  0xba   : > { %1620 = vmatmul.mubr.msk.bf16.vlgmr.msra.gmra.mrb[20].mxu1 %vm372_vm3, %v1547_v13  ;;  %v1117_v18 = vpop.permute.xlu0 %1116  ;;  %v1128_v24 = vsel %vm376_vm2, %v1121_v19, 0 }
  0xbb   : > { %1624 = vmatpush3.bf16.msra.mxu1 %v1024_v16  ;;  %v1122_v20 = vsel %vm1120_vm9, %v1115_v17, %v1117_v18  ;;  %1625 = vmatprep.mubr.msk.bf16.mxu1 %vm1674_vm0, %v1672_v6 }
  0xbc   : > { %v1119_v21 = vpop.permute.xlu1 %1118  ;;  %1556 = vmatprep.subr.msk.bf16.mxu0 %vm376_vm2, %v1122_v20  ;;  %1629 = vmatprep.subr.bf16.mxu1 %v1672_v6 }
  0xbd   : > { %v1123_v22 = vsel %vm1120_vm9, %v1117_v18, %v1119_v21 }
  0xbe   : > { %v1223_v25 = vpop.permute.xlu0 %1222  ;;  %v1134_v26 = vsel %vm376_vm2, %v1123_v22, 0 }
  0xc0   : > { %1553 = vmatmul.mubr.msk.bf16.vlgmr.msra.gmra.mrb[24].mxu0 %vm372_vm3, %v1551_v23  ;;  %v1225_v27 = vpop.permute.xlu1 %1224 }
  0xc1   : > { %1137 = vmatpush1.bf16.msra.mxu0 %v1128_v24  ;;  %1168 = vmatprep.mubr.bf16.mxu0 %v1673_v7  ;;  %v1231_v29 = vsel %vm1230_vm10, %v1223_v25, %v1225_v27 }
  0xc2   : > { %1626 = vmatmul.mubr.msk.bf16.vlgmr.msra.gmra.mrb[24].mxu1 %vm372_vm3, %v1551_v23  ;;  %v1227_v28 = vpop.permute.xlu0 %1226  ;;  %v1238_v34 = vsel %vm376_vm2, %v1231_v29, 0 }
  0xc3   : > { %1630 = vmatpush3.bf16.msra.mxu1 %v1134_v26  ;;  %v1232_v30 = vsel %vm1230_vm10, %v1225_v27, %v1227_v28  ;;  %1631 = vmatprep.mubr.msk.bf16.mxu1 %vm1674_vm0, %v1672_v6 }
  0xc4   : > { %v1229_v31 = vpop.permute.xlu1 %1228  ;;  %1560 = vmatprep.subr.msk.bf16.mxu0 %vm376_vm2, %v1232_v30  ;;  %1635 = vmatprep.subr.bf16.mxu1 %v1672_v6 }
  0xc5   : > { %v1233_v32 = vsel %vm1230_vm10, %v1227_v28, %v1229_v31 }
  0xc6   : > { %v1244_v35 = vsel %vm376_vm2, %v1233_v32, 0 }
  0xc8   : > { %1557 = vmatmul.mubr.msk.bf16.vlgmr.msra.gmra.mrb[28].mxu0 %vm372_vm3, %v1555_v33 }
  0xc9   : > { %1247 = vmatpush1.bf16.msra.mxu0 %v1238_v34  ;;  %1278 = vmatprep.mubr.bf16.mxu0 %v1673_v7 }
  0xca   : > { %1632 = vmatmul.mubr.msk.bf16.vlgmr.msra.gmra.mrb[28].mxu1 %vm372_vm3, %v1555_v33 }
  0xcb   : > { %1636 = vmatpush3.bf16.msra.mxu1 %v1244_v35  ;;  %1637 = vmatprep.mubr.msk.bf16.mxu1 %vm1674_vm0, %v1672_v6 }
  0xd0   : > { %1561 = vmatmul.mubr.msk.bf16.vlgmr.msra.gmra.mrb[32].mxu0 %vm372_vm3, %v1559_v36 }
  0xd2   : > { %1638 = vmatmul.mubr.msk.bf16.vlgmr.msra.gmra.mrb[32].mxu1 %vm372_vm3, %v1559_v36 }
 0x163   : > { %v420_v37 = vpop.f32.mrb[0].mxu0 }
 0x164   : > { %v422_v38 = vpop.f32.mrb[1].mxu0 }
 0x165   : > { %v424_v39 = vpop.f32.mrb[2].mxu0  ;;  %v461_v40 = vpop.f32.mrb[0].mxu1 }
 0x166   : > { %v425_v41 = vpop.f32.mrb[3].mxu0  ;;  %v1591_v7 = vpop.f32.mrb[1].mxu1 }
 0x167   : > { %v464_v42 = vpop.f32.mrb[2].mxu1 }
 0x168   : > { %v1592_v43 = vpop.f32.mrb[3].mxu1 }
 0x16b   : > { %v513_v44 = vpop.f32.mrb[4].mxu0 }
 0x16c   : > { %v514_v45 = vadd.f32 %v513_v44, %v420_v37  ;;  %v515_v46 = vpop.f32.mrb[5].mxu0 }
 0x16d   : > { %v516_v6 = vadd.f32 %v515_v46, %v422_v38  ;;  %v517_v47 = vpop.f32.mrb[6].mxu0  ;;  %v554_v48 = vpop.f32.mrb[4].mxu1 }
 0x16e   : > { %v555_v49 = vadd.f32 %v554_v48, %v461_v40  ;;  %v518_v50 = vpop.f32.mrb[7].mxu0  ;;  %v1597_v51 = vpop.f32.mrb[5].mxu1 }
 0x16f   : > { %v557_v52 = vpop.f32.mrb[6].mxu1 }
 0x170   : > { %v1598_v53 = vpop.f32.mrb[7].mxu1 }
 0x173   : > { %v620_v54 = vpop.f32.mrb[8].mxu0 }
 0x174   : > { %v667_v55 = vadd.f32 %v620_v54, %v514_v45  ;;  %v622_v56 = vpop.f32.mrb[9].mxu0 }
 0x175   : > { %v668_v57 = vadd.f32 %v622_v56, %v516_v6  ;;  %v624_v58 = vpop.f32.mrb[10].mxu0  ;;  %v661_v59 = vpop.f32.mrb[8].mxu1 }
 0x176   : > { %v669_v60 = vadd.f32 %v661_v59, %v555_v49  ;;  %v625_v61 = vpop.f32.mrb[11].mxu0  ;;  %v1603_v62 = vpop.f32.mrb[9].mxu1  ;;  %v1363_v49 = vld [vmem:[%s324_s20] sm:$0x7]  ;;  %v1368_v58 = vsub.s32 0, %v1733_v3 }
 0x177   : > { %v664_v63 = vpop.f32.mrb[10].mxu1  ;;  %v1376_v61 = vsub.s32 4, %v1733_v3 }
 0x178   : > { %v1604_v0 = vpop.f32.mrb[11].mxu1  ;;  %v1334_v63 = vpop.permute.xlu0 %1333 }
 0x17b   : > { %v730_v1 = vpop.f32.mrb[12].mxu0 }
 0x17c   : > { %v777_v2 = vadd.f32 %v730_v1, %v667_v55  ;;  %v732_v4 = vpop.f32.mrb[13].mxu0 }
 0x17d   : > { %v778_v5 = vadd.f32 %v732_v4, %v668_v57  ;;  %v734_v8 = vpop.f32.mrb[14].mxu0  ;;  %v771_v9 = vpop.f32.mrb[12].mxu1  ;;  %v1364_v57 = vunpack.c.l.bf16 %v1363_v49 }
 0x17e   : > { %v779_v10 = vadd.f32 %v771_v9, %v669_v60  ;;  %v735_v11 = vpop.f32.mrb[15].mxu0  ;;  %v1609_v12 = vpop.f32.mrb[13].mxu1  ;;  %v1372_v60 = vsub.s32 2, %v1733_v3 }
 0x17f   : > { %v774_v13 = vpop.f32.mrb[14].mxu1  ;;  %v1369_v0 = vrot.slane %v1364_v57, %v1368_v58 }
 0x180   : > { %v1610_v14 = vpop.f32.mrb[15].mxu1  ;;  %v1373_v4 = vrot.slane %v1364_v57, %v1372_v60 }
 0x183   : > { %v840_v15 = vpop.f32.mrb[16].mxu0 }
 0x184   : > { %v887_v16 = vadd.f32 %v840_v15, %v777_v2  ;;  %v842_v17 = vpop.f32.mrb[17].mxu0 }
 0x185   : > { %v888_v18 = vadd.f32 %v842_v17, %v778_v5  ;;  %v844_v19 = vpop.f32.mrb[18].mxu0  ;;  %v881_v20 = vpop.f32.mrb[16].mxu1  ;;  %v1384_v17 = vrot.slane %v1369_v0, %v1368_v58 }
 0x186   : > { %v889_v21 = vadd.f32 %v881_v20, %v779_v10  ;;  %v845_v22 = vpop.f32.mrb[19].mxu0  ;;  %v1615_v23 = vpop.f32.mrb[17].mxu1  ;;  %v1377_v10 = vrot.slane %v1364_v57, %v1376_v61  ;;  %v1388_v20 = vrot.slane %v1373_v4, %v1368_v58 }
 0x187   : > { %v884_v24 = vpop.f32.mrb[18].mxu1 }
 0x188   : > { %v1616_v25 = vpop.f32.mrb[19].mxu1  ;;  %v1392_v22 = vrot.slane %v1377_v10, %v1368_v58 }
 0x18b   : > { %v950_v26 = vpop.f32.mrb[20].mxu0 }
 0x18c   : > { %v997_v27 = vadd.f32 %v950_v26, %v887_v16  ;;  %v952_v28 = vpop.f32.mrb[21].mxu0 }
 0x18d   : > { %v998_v29 = vadd.f32 %v952_v28, %v888_v18  ;;  %v954_v30 = vpop.f32.mrb[22].mxu0  ;;  %v991_v31 = vpop.f32.mrb[20].mxu1 }
 0x18e   : > { %v999_v32 = vadd.f32 %v991_v31, %v889_v21  ;;  %v955_v33 = vpop.f32.mrb[23].mxu0  ;;  %v1621_v34 = vpop.f32.mrb[21].mxu1 }
 0x18f   : > { %v994_v35 = vpop.f32.mrb[22].mxu1 }
 0x190   : > { %v1622_v36 = vpop.f32.mrb[23].mxu1 }
 0x193   : > { %v1060_v37 = vpop.f32.mrb[24].mxu0 }
 0x194   : > { %v1107_v38 = vadd.f32 %v1060_v37, %v997_v27  ;;  %v1062_v39 = vpop.f32.mrb[25].mxu0 }
 0x195   : > { %v1108_v40 = vadd.f32 %v1062_v39, %v998_v29  ;;  %v1064_v41 = vpop.f32.mrb[26].mxu0  ;;  %v1101_v7 = vpop.f32.mrb[24].mxu1 }
 0x196   : > { %v1109_v42 = vadd.f32 %v1101_v7, %v999_v32  ;;  %v1065_v43 = vpop.f32.mrb[27].mxu0  ;;  %v1627_v44 = vpop.f32.mrb[25].mxu1 }
 0x197   : > { %v1104_v45 = vpop.f32.mrb[26].mxu1 }
 0x198   : > { %v1628_v46 = vpop.f32.mrb[27].mxu1 }
 0x19b   : > { %v1170_v6 = vpop.f32.mrb[28].mxu0 }
 0x19c   : > { %v1217_v47 = vadd.f32 %v1170_v6, %v1107_v38  ;;  %v1172_v48 = vpop.f32.mrb[29].mxu0 }
 0x19d   : > { %v1218_v50 = vadd.f32 %v1172_v48, %v1108_v40  ;;  %v1174_v51 = vpop.f32.mrb[30].mxu0  ;;  %v1211_v52 = vpop.f32.mrb[28].mxu1 }
 0x19e   : > { %v1219_v53 = vadd.f32 %v1211_v52, %v1109_v42  ;;  %v1175_v54 = vpop.f32.mrb[31].mxu0  ;;  %v1633_v55 = vpop.f32.mrb[29].mxu1 }
 0x19f   : > { %v1214_v56 = vpop.f32.mrb[30].mxu1 }
 0x1a0   : > { %v1634_v59 = vpop.f32.mrb[31].mxu1 }
 0x1a3   : > { %v1280_v62 = vpop.f32.mrb[32].mxu0 }
 0x1a4   : > { %v1327_v1 = vadd.f32 %v1280_v62, %v1217_v47  ;;  %v1282_v2 = vpop.f32.mrb[33].mxu0 }
 0x1a5   : > { %v1328_v5 = vadd.f32 %v1282_v2, %v1218_v50  ;;  %v1284_v8 = vpop.f32.mrb[34].mxu0  ;;  %v1321_v9 = vpop.f32.mrb[32].mxu1 }
 0x1a6   : > { %v1336_v11 = vadd.f32 %v1334_v63, %v1327_v1  ;;  %v1329_v12 = vadd.f32 %v1321_v9, %v1219_v53  ;;  %v1285_v13 = vpop.f32.mrb[35].mxu0  ;;  %v1639_v14 = vpop.f32.mrb[33].mxu1 }
 0x1a7   : > { %v1337_v15 = vadd.f32 %v1334_v63, %v1328_v5  ;;  %v1324_v16 = vpop.f32.mrb[34].mxu1 }
 0x1a8   : > { %vm1339_vm11 = vcmp.ge.f32.partialorder %v1336_v11, 0.0  ;;  %v1342_v3 = vmul.f32 0.2, %v1336_v11  ;;  %v1338_v18 = vadd.f32 %v1334_v63, %v1329_v12  ;;  %v1640_v19 = vpop.f32.mrb[35].mxu1 }
 0x1a9   : > { %vm1340_vm12 = vcmp.ge.f32.partialorder %v1337_v15, 0.0  ;;  %v1343_v21 = vmul.f32 0.2, %v1337_v15 }
 0x1aa   : > { %vm1341_vm13 = vcmp.ge.f32.partialorder %v1338_v18, 0.0  ;;  %v1344_v23 = vmul.f32 0.2, %v1338_v18  ;;  %v1345_v24 = vsel %vm1339_vm11, %v1336_v11, %v1342_v3 }
 0x1ab   : > { %v1346_v25 = vsel %vm1340_vm12, %v1337_v15, %v1343_v21  ;;  %v1393_v26 = vmul.f32 %v1384_v17, %v1345_v24 }
 0x1ac   : > { %v1347_v27 = vsel %vm1341_vm13, %v1338_v18, %v1344_v23  ;;  %v1567_v28 = vpack.c.bf16 %v1346_v25, %v1345_v24  ;;  %v1394_v29 = vmul.f32 %v1388_v20, %v1346_v25 }
 0x1ad   : > { %v1395_v30 = vmul.f32 %v1392_v22, %v1347_v27  ;;  %v1568_v31 = vpack.c.bf16 %v1347_v27, %v1347_v27  ;;  %v1400_v32 = vmul.f32 %v1393_v26, %v1345_v24 }
 0x1ae   : > { %1361 = vst [vmem:[%s330_s27] sm:$0xff] %v1567_v28  ;;  %v1396_v33 = vadd.f32 %v1394_v29, %v1393_v26  ;;  %v1401_v34 = vmul.f32 %v1394_v29, %v1346_v25 }
 0x1af   : > { %1362 = vst [vmem:[%s330_s27 + $0x8] sm:$0xf] %v1568_v31  ;;  %v1402_v35 = vmul.f32 %v1395_v30, %v1347_v27 }
 0x1b0   : > { %v1397_v36 = vadd.f32 %v1396_v33, %v1395_v30  ;;  %v1403_v37 = vadd.f32 %v1401_v34, %v1400_v32 }
 0x1b2   : > { %1398 = vadd.xlane.f32.xlu1 %v1397_v36  ;;  %v1404_v38 = vadd.f32 %v1403_v37, %v1402_v35 }
 0x1b4   : > { %1405 = vadd.xlane.f32.xlu0 %v1404_v38 }
 0x23f   : > { %v1399_v39 = vpop.xlane.xlu1 %1398 }
 0x241   : > { %v1406_v40 = vpop.xlane.xlu0 %1405 }
 0x242   : > { %v1408_v41 = vsel %vm1407_vm14, %v1399_v39, %v1406_v40 }
 0x243   : > { %1410 = vst.msk [vmem:[%s335_s30] sm:$0xff] %vm1409_vm15, %v1408_v41 }
 0x244 PF: > { %s17_s21 = sadd.s32 1, %s1669_s21  }
 0x245   : > { %p14_p7 = scmp.ge.s32.totalorder %s17_s21, 4  }
 0x247   :  { %16 = sbr.rel (!%p14_p7) target bundleno = 1 (0x1), region = 96 }

</bundles_post_ra>
